<compile_context>
chip_gen: v6e
topology: v6e:2x2x1
jax: 0.10.0
libtpu: 0.0.40
codegen_flags: <defaults>
</compile_context>

<pallas_src>
import jax
import jax.numpy as jnp
from jax.experimental import pallas as pl
from jax.experimental.pallas import tpu as pltpu

# ---------------- problem sizes ----------------
B = 2          # batch
T = 8          # sequence length
C_IN = 8       # input_size
H = 32         # lstm_units
K = 3          # conv_kernel
PAD = K // 2


def lstm_torch_kernel(x_ref, w_in_ref, b_in_ref, whh_ref, wo_ref, bo_ref,
                      out_ref):
    """Fused Conv1d + LSTM recurrence + final Linear.

    x_ref   : (B, T, C_in)   raw batch-major input (no wrapper pad/transpose)
    w_in_ref: (K*C_in, 4H)   conv weight folded into LSTM input projection,
                             i/f/o gate columns pre-scaled by 0.5
    b_in_ref: (1, 4H)        folded input-path bias (same 0.5 column scaling)
    whh_ref : (H, 4H)        weight_hh_l0.T, f32, same 0.5 column scaling
    wo_ref  : (1, H)         output Linear weight
    bo_ref  : (1, 1)         output Linear bias
    out_ref : (B, 1)
    """
    # ---------- hoisted input path (off the serial recurrence) ----------
    # Build the Toeplitz tap matrix (T*B, K*C) once: row block t holds the
    # conv taps [x[t-1], x[t], x[t+1]] (zeros at the sequence boundaries).
    zero_tap = jnp.zeros((B, C_IN), jnp.float32)
    row_blocks = []
    for t in range(T):
        taps = []
        for k in range(K):
            s = t + k - PAD                      # conv cross-correlation tap
            taps.append(x_ref[:, s, :] if 0 <= s < T else zero_tap)
        row_blocks.append(jnp.concatenate(taps, axis=-1))          # (B, K*C)
    lhs = jnp.concatenate(row_blocks, axis=0)                       # (T*B, K*C)

    # gates_x = (conv(x) + bc) @ wih + b, with i/f/o columns half-scaled;
    # a single (16,24)@(24,128) MXU push for the whole sequence.
    gx = (jnp.dot(lhs, w_in_ref[...], preferred_element_type=jnp.float32)
          + b_in_ref[...])                                          # (T*B, 4H)

    # ---------- serial recurrence: only h @ whh + cell math per step -------
    whh = whh_ref[...]                                              # (H, 4H) f32
    half = jnp.float32(0.5)

    h = jnp.zeros((B, H), jnp.float32)
    c = jnp.zeros((B, H), jnp.float32)
    # Static Python unroll (T=8): gx slices below are compile-time constants,
    # so the precomputed gates stay vreg-resident (no VMEM round-trip).
    for t in range(T):
        gates = gx[t * B:(t + 1) * B, :] + jnp.dot(
            h, whh, preferred_element_type=jnp.float32)             # (B, 4H)
        # One tanh over the full 4H vreg serves all gates:
        #   i/f/o columns were pre-scaled by 0.5  ->  sigmoid(x)=0.5*tanh(x/2)+0.5
        #   g column is full scale                ->  tanh(x)
        tnh = jnp.tanh(gates)
        i = half * tnh[:, 0 * H:1 * H] + half
        f = half * tnh[:, 1 * H:2 * H] + half
        g = tnh[:, 2 * H:3 * H]
        o = half * tnh[:, 3 * H:4 * H] + half
        c = f * c + i * g
        h = o * jnp.tanh(c)

    # Final Linear(H, 1): VPU multiply + lane reduction (skip an N=1 MXU op).
    out_ref[...] = (jnp.sum(h * wo_ref[...], axis=-1, keepdims=True)
                    + bo_ref[...])


def pack_params(params):
    """One-time weight layout prep + algebraic folding (model-load-time work)."""
    wc, bc, wih, whh, bih, bhh, wo, bo = params
    wih_t = wih.T                                                   # (H, 4H)
    wc_flat = jnp.transpose(wc, (2, 1, 0)).reshape(K * C_IN, H)     # (K*C, H)

    # Fold conv into the LSTM input projection (done once, off the kernel).
    w_in = jnp.dot(wc_flat, wih_t)                                  # (K*C, 4H)
    b_in = (bc.reshape(1, H) @ wih_t) + (bih + bhh).reshape(1, 4 * H)

    # Pre-scale i/f/o gate columns by 0.5 so the kernel needs only tanh
    # (torch gate order: i, f, g, o).
    scale = jnp.concatenate([jnp.full((1, H), 0.5, jnp.float32),
                             jnp.full((1, H), 0.5, jnp.float32),
                             jnp.ones((1, H), jnp.float32),
                             jnp.full((1, H), 0.5, jnp.float32)], axis=1)
    w_in_s = (w_in * scale).astype(jnp.float32)
    b_in_s = (b_in * scale).astype(jnp.float32)
    whh_s = (whh.T * scale).astype(jnp.float32)                     # (H, 4H) f32

    wo_r = wo.reshape(1, H)
    bo_r = bo.reshape(1, 1)
    return (w_in_s, b_in_s, whh_s, wo_r, bo_r)


def lstm_torch_forward(x, packed):
    """x: (B, T, C_in) float32, returns (B, 1) float32. No per-call data prep."""
    w_in_s, b_in_s, whh_s, wo_r, bo_r = packed
    vmem = pl.BlockSpec(memory_space=pltpu.MemorySpace.VMEM)
    return pl.pallas_call(
        lstm_torch_kernel,
        out_shape=jax.ShapeDtypeStruct((B, 1), jnp.float32),
        in_specs=[vmem] * 6,
        out_specs=vmem,
    )(x, w_in_s, b_in_s, whh_s, wo_r, bo_r)


def init_params(key):
    """Deterministic parameter init (torch-like uniform(-1/sqrt(fan), ...))."""
    ks = jax.random.split(key, 8)

    def u(k, shape, fan):
        bound = 1.0 / jnp.sqrt(float(fan))
        return jax.random.uniform(k, shape, jnp.float32, -bound, bound)

    wc = u(ks[0], (H, C_IN, K), C_IN * K)        # conv1d.weight
    bc = u(ks[1], (H,), C_IN * K)                # conv1d.bias
    wih = u(ks[2], (4 * H, H), H)                # lstm.weight_ih_l0 (input=H after conv)
    whh = u(ks[3], (4 * H, H), H)                # lstm.weight_hh_l0
    bih = u(ks[4], (4 * H,), H)                  # lstm.bias_ih_l0
    bhh = u(ks[5], (4 * H,), H)                  # lstm.bias_hh_l0
    wo = u(ks[6], (1, H), H)                     # output.weight
    bo = u(ks[7], (1,), H)                       # output.bias
    return (wc, bc, wih, whh, bih, bhh, wo, bo)


def ref_forward(x, params):
    """Pure-JAX f32 reference matching the PyTorch math (no algebraic folding)."""
    wc, bc, wih, whh, bih, bhh, wo, bo = params
    xp = jnp.pad(x, ((0, 0), (PAD, PAD), (0, 0)))
    wc_k = jnp.transpose(wc, (2, 1, 0))
    y = jnp.stack(
        [sum(xp[:, t + k, :] @ wc_k[k] for k in range(K)) + bc
         for t in range(T)], axis=1)                       # (B, T, H)
    h = jnp.zeros((B, H), jnp.float32)
    c = jnp.zeros((B, H), jnp.float32)
    bsum = bih + bhh
    for t in range(T):
        g_all = y[:, t, :] @ wih.T + h @ whh.T + bsum
        i = jax.nn.sigmoid(g_all[:, 0 * H:1 * H])
        f = jax.nn.sigmoid(g_all[:, 1 * H:2 * H])
        g = jnp.tanh(g_all[:, 2 * H:3 * H])
        o = jax.nn.sigmoid(g_all[:, 3 * H:4 * H])
        c = f * c + i * g
        h = o * jnp.tanh(c)
    return h @ wo.T + bo


if __name__ == "__main__":
    key = jax.random.PRNGKey(0)
    kx, kp = jax.random.split(key)
    x = jax.random.normal(kx, (B, T, C_IN), jnp.float32)
    params = init_params(kp)
    packed = pack_params(params)

    out = lstm_torch_forward(x, packed)
    out = jax.block_until_ready(out)

    ref = ref_forward(x, params)
    assert out.shape == (B, 1)
    # All-f32 path; only re-association (conv folding, sigmoid-as-tanh) differs
    # from the reference rounding order.
    assert jnp.allclose(out, ref, atol=1e-3, rtol=1e-3)

    print("KERNEL_OK")
</pallas_src>

<mosaic_0001>
module attributes {stable_mosaic.version = 11 : i64} {
  func.func @lstm_torch_kernel(%arg0: memref<2x8x8xf32, #tpu.memory_space<vmem>>, %arg1: memref<24x128xf32, #tpu.memory_space<vmem>>, %arg2: memref<1x128xf32, #tpu.memory_space<vmem>>, %arg3: memref<32x128xf32, #tpu.memory_space<vmem>>, %arg4: memref<1x32xf32, #tpu.memory_space<vmem>>, %arg5: memref<1x1xf32, #tpu.memory_space<vmem>>, %arg6: memref<2x1xf32, #tpu.memory_space<vmem>>) attributes {dimension_semantics = [], scalar_prefetch = 0 : i64, scratch_operands = 0 : i64, tpu.core_type = #tpu.core_type<tc>} {
    %cst = arith.constant 0.000000e+00 : f32
    %0 = vector.broadcast %cst : f32 to vector<2x8xf32>
    %c0 = arith.constant 0 : index
    %c0_0 = arith.constant 0 : index
    %c0_1 = arith.constant 0 : index
    %1 = vector.load %arg0[%c0, %c0_0, %c0_1] : memref<2x8x8xf32, #tpu.memory_space<vmem>>, vector<2x1x8xf32>
    %2 = vector.shape_cast %1 : vector<2x1x8xf32> to vector<2x8xf32>
    %c0_2 = arith.constant 0 : index
    %c1 = arith.constant 1 : index
    %c0_3 = arith.constant 0 : index
    %3 = vector.load %arg0[%c0_2, %c1, %c0_3] : memref<2x8x8xf32, #tpu.memory_space<vmem>>, vector<2x1x8xf32>
    %4 = vector.shape_cast %3 : vector<2x1x8xf32> to vector<2x8xf32>
    %5 = tpu.concatenate %0, %2, %4 in 1 : vector<2x8xf32>, vector<2x8xf32>, vector<2x8xf32> -> vector<2x24xf32>
    %c0_4 = arith.constant 0 : index
    %c0_5 = arith.constant 0 : index
    %c0_6 = arith.constant 0 : index
    %6 = vector.load %arg0[%c0_4, %c0_5, %c0_6] : memref<2x8x8xf32, #tpu.memory_space<vmem>>, vector<2x1x8xf32>
    %7 = vector.shape_cast %6 : vector<2x1x8xf32> to vector<2x8xf32>
    %c0_7 = arith.constant 0 : index
    %c1_8 = arith.constant 1 : index
    %c0_9 = arith.constant 0 : index
    %8 = vector.load %arg0[%c0_7, %c1_8, %c0_9] : memref<2x8x8xf32, #tpu.memory_space<vmem>>, vector<2x1x8xf32>
    %9 = vector.shape_cast %8 : vector<2x1x8xf32> to vector<2x8xf32>
    %c0_10 = arith.constant 0 : index
    %c2 = arith.constant 2 : index
    %c0_11 = arith.constant 0 : index
    %10 = vector.load %arg0[%c0_10, %c2, %c0_11] : memref<2x8x8xf32, #tpu.memory_space<vmem>>, vector<2x1x8xf32>
    %11 = vector.shape_cast %10 : vector<2x1x8xf32> to vector<2x8xf32>
    %12 = tpu.concatenate %7, %9, %11 in 1 : vector<2x8xf32>, vector<2x8xf32>, vector<2x8xf32> -> vector<2x24xf32>
    %c0_12 = arith.constant 0 : index
    %c1_13 = arith.constant 1 : index
    %c0_14 = arith.constant 0 : index
    %13 = vector.load %arg0[%c0_12, %c1_13, %c0_14] : memref<2x8x8xf32, #tpu.memory_space<vmem>>, vector<2x1x8xf32>
    %14 = vector.shape_cast %13 : vector<2x1x8xf32> to vector<2x8xf32>
    %c0_15 = arith.constant 0 : index
    %c2_16 = arith.constant 2 : index
    %c0_17 = arith.constant 0 : index
    %15 = vector.load %arg0[%c0_15, %c2_16, %c0_17] : memref<2x8x8xf32, #tpu.memory_space<vmem>>, vector<2x1x8xf32>
    %16 = vector.shape_cast %15 : vector<2x1x8xf32> to vector<2x8xf32>
    %c0_18 = arith.constant 0 : index
    %c3 = arith.constant 3 : index
    %c0_19 = arith.constant 0 : index
    %17 = vector.load %arg0[%c0_18, %c3, %c0_19] : memref<2x8x8xf32, #tpu.memory_space<vmem>>, vector<2x1x8xf32>
    %18 = vector.shape_cast %17 : vector<2x1x8xf32> to vector<2x8xf32>
    %19 = tpu.concatenate %14, %16, %18 in 1 : vector<2x8xf32>, vector<2x8xf32>, vector<2x8xf32> -> vector<2x24xf32>
    %c0_20 = arith.constant 0 : index
    %c2_21 = arith.constant 2 : index
    %c0_22 = arith.constant 0 : index
    %20 = vector.load %arg0[%c0_20, %c2_21, %c0_22] : memref<2x8x8xf32, #tpu.memory_space<vmem>>, vector<2x1x8xf32>
    %21 = vector.shape_cast %20 : vector<2x1x8xf32> to vector<2x8xf32>
    %c0_23 = arith.constant 0 : index
    %c3_24 = arith.constant 3 : index
    %c0_25 = arith.constant 0 : index
    %22 = vector.load %arg0[%c0_23, %c3_24, %c0_25] : memref<2x8x8xf32, #tpu.memory_space<vmem>>, vector<2x1x8xf32>
    %23 = vector.shape_cast %22 : vector<2x1x8xf32> to vector<2x8xf32>
    %c0_26 = arith.constant 0 : index
    %c4 = arith.constant 4 : index
    %c0_27 = arith.constant 0 : index
    %24 = vector.load %arg0[%c0_26, %c4, %c0_27] : memref<2x8x8xf32, #tpu.memory_space<vmem>>, vector<2x1x8xf32>
    %25 = vector.shape_cast %24 : vector<2x1x8xf32> to vector<2x8xf32>
    %26 = tpu.concatenate %21, %23, %25 in 1 : vector<2x8xf32>, vector<2x8xf32>, vector<2x8xf32> -> vector<2x24xf32>
    %c0_28 = arith.constant 0 : index
    %c3_29 = arith.constant 3 : index
    %c0_30 = arith.constant 0 : index
    %27 = vector.load %arg0[%c0_28, %c3_29, %c0_30] : memref<2x8x8xf32, #tpu.memory_space<vmem>>, vector<2x1x8xf32>
    %28 = vector.shape_cast %27 : vector<2x1x8xf32> to vector<2x8xf32>
    %c0_31 = arith.constant 0 : index
    %c4_32 = arith.constant 4 : index
    %c0_33 = arith.constant 0 : index
    %29 = vector.load %arg0[%c0_31, %c4_32, %c0_33] : memref<2x8x8xf32, #tpu.memory_space<vmem>>, vector<2x1x8xf32>
    %30 = vector.shape_cast %29 : vector<2x1x8xf32> to vector<2x8xf32>
    %c0_34 = arith.constant 0 : index
    %c5 = arith.constant 5 : index
    %c0_35 = arith.constant 0 : index
    %31 = vector.load %arg0[%c0_34, %c5, %c0_35] : memref<2x8x8xf32, #tpu.memory_space<vmem>>, vector<2x1x8xf32>
    %32 = vector.shape_cast %31 : vector<2x1x8xf32> to vector<2x8xf32>
    %33 = tpu.concatenate %28, %30, %32 in 1 : vector<2x8xf32>, vector<2x8xf32>, vector<2x8xf32> -> vector<2x24xf32>
    %c0_36 = arith.constant 0 : index
    %c4_37 = arith.constant 4 : index
    %c0_38 = arith.constant 0 : index
    %34 = vector.load %arg0[%c0_36, %c4_37, %c0_38] : memref<2x8x8xf32, #tpu.memory_space<vmem>>, vector<2x1x8xf32>
    %35 = vector.shape_cast %34 : vector<2x1x8xf32> to vector<2x8xf32>
    %c0_39 = arith.constant 0 : index
    %c5_40 = arith.constant 5 : index
    %c0_41 = arith.constant 0 : index
    %36 = vector.load %arg0[%c0_39, %c5_40, %c0_41] : memref<2x8x8xf32, #tpu.memory_space<vmem>>, vector<2x1x8xf32>
    %37 = vector.shape_cast %36 : vector<2x1x8xf32> to vector<2x8xf32>
    %c0_42 = arith.constant 0 : index
    %c6 = arith.constant 6 : index
    %c0_43 = arith.constant 0 : index
    %38 = vector.load %arg0[%c0_42, %c6, %c0_43] : memref<2x8x8xf32, #tpu.memory_space<vmem>>, vector<2x1x8xf32>
    %39 = vector.shape_cast %38 : vector<2x1x8xf32> to vector<2x8xf32>
    %40 = tpu.concatenate %35, %37, %39 in 1 : vector<2x8xf32>, vector<2x8xf32>, vector<2x8xf32> -> vector<2x24xf32>
    %c0_44 = arith.constant 0 : index
    %c5_45 = arith.constant 5 : index
    %c0_46 = arith.constant 0 : index
    %41 = vector.load %arg0[%c0_44, %c5_45, %c0_46] : memref<2x8x8xf32, #tpu.memory_space<vmem>>, vector<2x1x8xf32>
    %42 = vector.shape_cast %41 : vector<2x1x8xf32> to vector<2x8xf32>
    %c0_47 = arith.constant 0 : index
    %c6_48 = arith.constant 6 : index
    %c0_49 = arith.constant 0 : index
    %43 = vector.load %arg0[%c0_47, %c6_48, %c0_49] : memref<2x8x8xf32, #tpu.memory_space<vmem>>, vector<2x1x8xf32>
    %44 = vector.shape_cast %43 : vector<2x1x8xf32> to vector<2x8xf32>
    %c0_50 = arith.constant 0 : index
    %c7 = arith.constant 7 : index
    %c0_51 = arith.constant 0 : index
    %45 = vector.load %arg0[%c0_50, %c7, %c0_51] : memref<2x8x8xf32, #tpu.memory_space<vmem>>, vector<2x1x8xf32>
    %46 = vector.shape_cast %45 : vector<2x1x8xf32> to vector<2x8xf32>
    %47 = tpu.concatenate %42, %44, %46 in 1 : vector<2x8xf32>, vector<2x8xf32>, vector<2x8xf32> -> vector<2x24xf32>
    %c0_52 = arith.constant 0 : index
    %c6_53 = arith.constant 6 : index
    %c0_54 = arith.constant 0 : index
    %48 = vector.load %arg0[%c0_52, %c6_53, %c0_54] : memref<2x8x8xf32, #tpu.memory_space<vmem>>, vector<2x1x8xf32>
    %49 = vector.shape_cast %48 : vector<2x1x8xf32> to vector<2x8xf32>
    %c0_55 = arith.constant 0 : index
    %c7_56 = arith.constant 7 : index
    %c0_57 = arith.constant 0 : index
    %50 = vector.load %arg0[%c0_55, %c7_56, %c0_57] : memref<2x8x8xf32, #tpu.memory_space<vmem>>, vector<2x1x8xf32>
    %51 = vector.shape_cast %50 : vector<2x1x8xf32> to vector<2x8xf32>
    %52 = tpu.concatenate %49, %51, %0 in 1 : vector<2x8xf32>, vector<2x8xf32>, vector<2x8xf32> -> vector<2x24xf32>
    %53 = tpu.concatenate %5, %12, %19, %26, %33, %40, %47, %52 in 0 : vector<2x24xf32>, vector<2x24xf32>, vector<2x24xf32>, vector<2x24xf32>, vector<2x24xf32>, vector<2x24xf32>, vector<2x24xf32>, vector<2x24xf32> -> vector<16x24xf32>
    %c0_58 = arith.constant 0 : index
    %c0_59 = arith.constant 0 : index
    %54 = vector.load %arg1[%c0_58, %c0_59] : memref<24x128xf32, #tpu.memory_space<vmem>>, vector<24x128xf32>
    %cst_60 = arith.constant dense<0.000000e+00> : vector<16x128xf32>
    %55 = tpu.matmul %53, %54, %cst_60 {dimension_numbers = #tpu.dot_dimension_numbers<[1], [0], [0], [1], [0, 0, 1, 1], [], []>} : vector<16x24xf32>, vector<24x128xf32>, vector<16x128xf32> -> vector<16x128xf32>
    %c0_61 = arith.constant 0 : index
    %c0_62 = arith.constant 0 : index
    %56 = vector.load %arg2[%c0_61, %c0_62] : memref<1x128xf32, #tpu.memory_space<vmem>>, vector<1x128xf32>
    %57 = vector.broadcast %56 : vector<1x128xf32> to vector<16x128xf32>
    %58 = arith.addf %55, %57 : vector<16x128xf32>
    %c0_63 = arith.constant 0 : index
    %c0_64 = arith.constant 0 : index
    %59 = vector.load %arg3[%c0_63, %c0_64] : memref<32x128xf32, #tpu.memory_space<vmem>>, vector<32x128xf32>
    %cst_65 = arith.constant 0.000000e+00 : f32
    %60 = vector.broadcast %cst_65 : f32 to vector<2x32xf32>
    %cst_66 = arith.constant 0.000000e+00 : f32
    %61 = vector.broadcast %cst_66 : f32 to vector<2x32xf32>
    %62 = vector.extract_strided_slice %58 {offsets = [0, 0], sizes = [2, 128], strides = [1, 1]} : vector<16x128xf32> to vector<2x128xf32>
    %cst_67 = arith.constant dense<0.000000e+00> : vector<2x128xf32>
    %63 = tpu.matmul %60, %59, %cst_67 {dimension_numbers = #tpu.dot_dimension_numbers<[1], [0], [0], [1], [0, 0, 1, 1], [], []>} : vector<2x32xf32>, vector<32x128xf32>, vector<2x128xf32> -> vector<2x128xf32>
    %64 = arith.addf %62, %63 : vector<2x128xf32>
    %65 = math.tanh %64 : vector<2x128xf32>
    %66 = vector.extract_strided_slice %65 {offsets = [0, 0], sizes = [2, 32], strides = [1, 1]} : vector<2x128xf32> to vector<2x32xf32>
    %cst_68 = arith.constant 5.000000e-01 : f32
    %67 = vector.broadcast %cst_68 : f32 to vector<2x32xf32>
    %68 = arith.mulf %67, %66 : vector<2x32xf32>
    %cst_69 = arith.constant 5.000000e-01 : f32
    %69 = vector.broadcast %cst_69 : f32 to vector<2x32xf32>
    %70 = arith.addf %68, %69 : vector<2x32xf32>
    %71 = vector.extract_strided_slice %65 {offsets = [0, 32], sizes = [2, 32], strides = [1, 1]} : vector<2x128xf32> to vector<2x32xf32>
    %cst_70 = arith.constant 5.000000e-01 : f32
    %72 = vector.broadcast %cst_70 : f32 to vector<2x32xf32>
    %73 = arith.mulf %72, %71 : vector<2x32xf32>
    %cst_71 = arith.constant 5.000000e-01 : f32
    %74 = vector.broadcast %cst_71 : f32 to vector<2x32xf32>
    %75 = arith.addf %73, %74 : vector<2x32xf32>
    %76 = vector.extract_strided_slice %65 {offsets = [0, 64], sizes = [2, 32], strides = [1, 1]} : vector<2x128xf32> to vector<2x32xf32>
    %77 = vector.extract_strided_slice %65 {offsets = [0, 96], sizes = [2, 32], strides = [1, 1]} : vector<2x128xf32> to vector<2x32xf32>
    %cst_72 = arith.constant 5.000000e-01 : f32
    %78 = vector.broadcast %cst_72 : f32 to vector<2x32xf32>
    %79 = arith.mulf %78, %77 : vector<2x32xf32>
    %cst_73 = arith.constant 5.000000e-01 : f32
    %80 = vector.broadcast %cst_73 : f32 to vector<2x32xf32>
    %81 = arith.addf %79, %80 : vector<2x32xf32>
    %82 = arith.mulf %75, %61 : vector<2x32xf32>
    %83 = arith.mulf %70, %76 : vector<2x32xf32>
    %84 = arith.addf %82, %83 : vector<2x32xf32>
    %85 = math.tanh %84 : vector<2x32xf32>
    %86 = arith.mulf %81, %85 : vector<2x32xf32>
    %87 = vector.extract_strided_slice %58 {offsets = [2, 0], sizes = [2, 128], strides = [1, 1]} : vector<16x128xf32> to vector<2x128xf32>
    %cst_74 = arith.constant dense<0.000000e+00> : vector<2x128xf32>
    %88 = tpu.matmul %86, %59, %cst_74 {dimension_numbers = #tpu.dot_dimension_numbers<[1], [0], [0], [1], [0, 0, 1, 1], [], []>} : vector<2x32xf32>, vector<32x128xf32>, vector<2x128xf32> -> vector<2x128xf32>
    %89 = arith.addf %87, %88 : vector<2x128xf32>
    %90 = math.tanh %89 : vector<2x128xf32>
    %91 = vector.extract_strided_slice %90 {offsets = [0, 0], sizes = [2, 32], strides = [1, 1]} : vector<2x128xf32> to vector<2x32xf32>
    %cst_75 = arith.constant 5.000000e-01 : f32
    %92 = vector.broadcast %cst_75 : f32 to vector<2x32xf32>
    %93 = arith.mulf %92, %91 : vector<2x32xf32>
    %cst_76 = arith.constant 5.000000e-01 : f32
    %94 = vector.broadcast %cst_76 : f32 to vector<2x32xf32>
    %95 = arith.addf %93, %94 : vector<2x32xf32>
    %96 = vector.extract_strided_slice %90 {offsets = [0, 32], sizes = [2, 32], strides = [1, 1]} : vector<2x128xf32> to vector<2x32xf32>
    %cst_77 = arith.constant 5.000000e-01 : f32
    %97 = vector.broadcast %cst_77 : f32 to vector<2x32xf32>
    %98 = arith.mulf %97, %96 : vector<2x32xf32>
    %cst_78 = arith.constant 5.000000e-01 : f32
    %99 = vector.broadcast %cst_78 : f32 to vector<2x32xf32>
    %100 = arith.addf %98, %99 : vector<2x32xf32>
    %101 = vector.extract_strided_slice %90 {offsets = [0, 64], sizes = [2, 32], strides = [1, 1]} : vector<2x128xf32> to vector<2x32xf32>
    %102 = vector.extract_strided_slice %90 {offsets = [0, 96], sizes = [2, 32], strides = [1, 1]} : vector<2x128xf32> to vector<2x32xf32>
    %cst_79 = arith.constant 5.000000e-01 : f32
    %103 = vector.broadcast %cst_79 : f32 to vector<2x32xf32>
    %104 = arith.mulf %103, %102 : vector<2x32xf32>
    %cst_80 = arith.constant 5.000000e-01 : f32
    %105 = vector.broadcast %cst_80 : f32 to vector<2x32xf32>
    %106 = arith.addf %104, %105 : vector<2x32xf32>
    %107 = arith.mulf %100, %84 : vector<2x32xf32>
    %108 = arith.mulf %95, %101 : vector<2x32xf32>
    %109 = arith.addf %107, %108 : vector<2x32xf32>
    %110 = math.tanh %109 : vector<2x32xf32>
    %111 = arith.mulf %106, %110 : vector<2x32xf32>
    %112 = vector.extract_strided_slice %58 {offsets = [4, 0], sizes = [2, 128], strides = [1, 1]} : vector<16x128xf32> to vector<2x128xf32>
    %cst_81 = arith.constant dense<0.000000e+00> : vector<2x128xf32>
    %113 = tpu.matmul %111, %59, %cst_81 {dimension_numbers = #tpu.dot_dimension_numbers<[1], [0], [0], [1], [0, 0, 1, 1], [], []>} : vector<2x32xf32>, vector<32x128xf32>, vector<2x128xf32> -> vector<2x128xf32>
    %114 = arith.addf %112, %113 : vector<2x128xf32>
    %115 = math.tanh %114 : vector<2x128xf32>
    %116 = vector.extract_strided_slice %115 {offsets = [0, 0], sizes = [2, 32], strides = [1, 1]} : vector<2x128xf32> to vector<2x32xf32>
    %cst_82 = arith.constant 5.000000e-01 : f32
    %117 = vector.broadcast %cst_82 : f32 to vector<2x32xf32>
    %118 = arith.mulf %117, %116 : vector<2x32xf32>
    %cst_83 = arith.constant 5.000000e-01 : f32
    %119 = vector.broadcast %cst_83 : f32 to vector<2x32xf32>
    %120 = arith.addf %118, %119 : vector<2x32xf32>
    %121 = vector.extract_strided_slice %115 {offsets = [0, 32], sizes = [2, 32], strides = [1, 1]} : vector<2x128xf32> to vector<2x32xf32>
    %cst_84 = arith.constant 5.000000e-01 : f32
    %122 = vector.broadcast %cst_84 : f32 to vector<2x32xf32>
    %123 = arith.mulf %122, %121 : vector<2x32xf32>
    %cst_85 = arith.constant 5.000000e-01 : f32
    %124 = vector.broadcast %cst_85 : f32 to vector<2x32xf32>
    %125 = arith.addf %123, %124 : vector<2x32xf32>
    %126 = vector.extract_strided_slice %115 {offsets = [0, 64], sizes = [2, 32], strides = [1, 1]} : vector<2x128xf32> to vector<2x32xf32>
    %127 = vector.extract_strided_slice %115 {offsets = [0, 96], sizes = [2, 32], strides = [1, 1]} : vector<2x128xf32> to vector<2x32xf32>
    %cst_86 = arith.constant 5.000000e-01 : f32
    %128 = vector.broadcast %cst_86 : f32 to vector<2x32xf32>
    %129 = arith.mulf %128, %127 : vector<2x32xf32>
    %cst_87 = arith.constant 5.000000e-01 : f32
    %130 = vector.broadcast %cst_87 : f32 to vector<2x32xf32>
    %131 = arith.addf %129, %130 : vector<2x32xf32>
    %132 = arith.mulf %125, %109 : vector<2x32xf32>
    %133 = arith.mulf %120, %126 : vector<2x32xf32>
    %134 = arith.addf %132, %133 : vector<2x32xf32>
    %135 = math.tanh %134 : vector<2x32xf32>
    %136 = arith.mulf %131, %135 : vector<2x32xf32>
    %137 = vector.extract_strided_slice %58 {offsets = [6, 0], sizes = [2, 128], strides = [1, 1]} : vector<16x128xf32> to vector<2x128xf32>
    %cst_88 = arith.constant dense<0.000000e+00> : vector<2x128xf32>
    %138 = tpu.matmul %136, %59, %cst_88 {dimension_numbers = #tpu.dot_dimension_numbers<[1], [0], [0], [1], [0, 0, 1, 1], [], []>} : vector<2x32xf32>, vector<32x128xf32>, vector<2x128xf32> -> vector<2x128xf32>
    %139 = arith.addf %137, %138 : vector<2x128xf32>
    %140 = math.tanh %139 : vector<2x128xf32>
    %141 = vector.extract_strided_slice %140 {offsets = [0, 0], sizes = [2, 32], strides = [1, 1]} : vector<2x128xf32> to vector<2x32xf32>
    %cst_89 = arith.constant 5.000000e-01 : f32
    %142 = vector.broadcast %cst_89 : f32 to vector<2x32xf32>
    %143 = arith.mulf %142, %141 : vector<2x32xf32>
    %cst_90 = arith.constant 5.000000e-01 : f32
    %144 = vector.broadcast %cst_90 : f32 to vector<2x32xf32>
    %145 = arith.addf %143, %144 : vector<2x32xf32>
    %146 = vector.extract_strided_slice %140 {offsets = [0, 32], sizes = [2, 32], strides = [1, 1]} : vector<2x128xf32> to vector<2x32xf32>
    %cst_91 = arith.constant 5.000000e-01 : f32
    %147 = vector.broadcast %cst_91 : f32 to vector<2x32xf32>
    %148 = arith.mulf %147, %146 : vector<2x32xf32>
    %cst_92 = arith.constant 5.000000e-01 : f32
    %149 = vector.broadcast %cst_92 : f32 to vector<2x32xf32>
    %150 = arith.addf %148, %149 : vector<2x32xf32>
    %151 = vector.extract_strided_slice %140 {offsets = [0, 64], sizes = [2, 32], strides = [1, 1]} : vector<2x128xf32> to vector<2x32xf32>
    %152 = vector.extract_strided_slice %140 {offsets = [0, 96], sizes = [2, 32], strides = [1, 1]} : vector<2x128xf32> to vector<2x32xf32>
    %cst_93 = arith.constant 5.000000e-01 : f32
    %153 = vector.broadcast %cst_93 : f32 to vector<2x32xf32>
    %154 = arith.mulf %153, %152 : vector<2x32xf32>
    %cst_94 = arith.constant 5.000000e-01 : f32
    %155 = vector.broadcast %cst_94 : f32 to vector<2x32xf32>
    %156 = arith.addf %154, %155 : vector<2x32xf32>
    %157 = arith.mulf %150, %134 : vector<2x32xf32>
    %158 = arith.mulf %145, %151 : vector<2x32xf32>
    %159 = arith.addf %157, %158 : vector<2x32xf32>
    %160 = math.tanh %159 : vector<2x32xf32>
    %161 = arith.mulf %156, %160 : vector<2x32xf32>
    %162 = vector.extract_strided_slice %58 {offsets = [8, 0], sizes = [2, 128], strides = [1, 1]} : vector<16x128xf32> to vector<2x128xf32>
    %cst_95 = arith.constant dense<0.000000e+00> : vector<2x128xf32>
    %163 = tpu.matmul %161, %59, %cst_95 {dimension_numbers = #tpu.dot_dimension_numbers<[1], [0], [0], [1], [0, 0, 1, 1], [], []>} : vector<2x32xf32>, vector<32x128xf32>, vector<2x128xf32> -> vector<2x128xf32>
    %164 = arith.addf %162, %163 : vector<2x128xf32>
    %165 = math.tanh %164 : vector<2x128xf32>
    %166 = vector.extract_strided_slice %165 {offsets = [0, 0], sizes = [2, 32], strides = [1, 1]} : vector<2x128xf32> to vector<2x32xf32>
    %cst_96 = arith.constant 5.000000e-01 : f32
    %167 = vector.broadcast %cst_96 : f32 to vector<2x32xf32>
    %168 = arith.mulf %167, %166 : vector<2x32xf32>
    %cst_97 = arith.constant 5.000000e-01 : f32
    %169 = vector.broadcast %cst_97 : f32 to vector<2x32xf32>
    %170 = arith.addf %168, %169 : vector<2x32xf32>
    %171 = vector.extract_strided_slice %165 {offsets = [0, 32], sizes = [2, 32], strides = [1, 1]} : vector<2x128xf32> to vector<2x32xf32>
    %cst_98 = arith.constant 5.000000e-01 : f32
    %172 = vector.broadcast %cst_98 : f32 to vector<2x32xf32>
    %173 = arith.mulf %172, %171 : vector<2x32xf32>
    %cst_99 = arith.constant 5.000000e-01 : f32
    %174 = vector.broadcast %cst_99 : f32 to vector<2x32xf32>
    %175 = arith.addf %173, %174 : vector<2x32xf32>
    %176 = vector.extract_strided_slice %165 {offsets = [0, 64], sizes = [2, 32], strides = [1, 1]} : vector<2x128xf32> to vector<2x32xf32>
    %177 = vector.extract_strided_slice %165 {offsets = [0, 96], sizes = [2, 32], strides = [1, 1]} : vector<2x128xf32> to vector<2x32xf32>
    %cst_100 = arith.constant 5.000000e-01 : f32
    %178 = vector.broadcast %cst_100 : f32 to vector<2x32xf32>
    %179 = arith.mulf %178, %177 : vector<2x32xf32>
    %cst_101 = arith.constant 5.000000e-01 : f32
    %180 = vector.broadcast %cst_101 : f32 to vector<2x32xf32>
    %181 = arith.addf %179, %180 : vector<2x32xf32>
    %182 = arith.mulf %175, %159 : vector<2x32xf32>
    %183 = arith.mulf %170, %176 : vector<2x32xf32>
    %184 = arith.addf %182, %183 : vector<2x32xf32>
    %185 = math.tanh %184 : vector<2x32xf32>
    %186 = arith.mulf %181, %185 : vector<2x32xf32>
    %187 = vector.extract_strided_slice %58 {offsets = [10, 0], sizes = [2, 128], strides = [1, 1]} : vector<16x128xf32> to vector<2x128xf32>
    %cst_102 = arith.constant dense<0.000000e+00> : vector<2x128xf32>
    %188 = tpu.matmul %186, %59, %cst_102 {dimension_numbers = #tpu.dot_dimension_numbers<[1], [0], [0], [1], [0, 0, 1, 1], [], []>} : vector<2x32xf32>, vector<32x128xf32>, vector<2x128xf32> -> vector<2x128xf32>
    %189 = arith.addf %187, %188 : vector<2x128xf32>
    %190 = math.tanh %189 : vector<2x128xf32>
    %191 = vector.extract_strided_slice %190 {offsets = [0, 0], sizes = [2, 32], strides = [1, 1]} : vector<2x128xf32> to vector<2x32xf32>
    %cst_103 = arith.constant 5.000000e-01 : f32
    %192 = vector.broadcast %cst_103 : f32 to vector<2x32xf32>
    %193 = arith.mulf %192, %191 : vector<2x32xf32>
    %cst_104 = arith.constant 5.000000e-01 : f32
    %194 = vector.broadcast %cst_104 : f32 to vector<2x32xf32>
    %195 = arith.addf %193, %194 : vector<2x32xf32>
    %196 = vector.extract_strided_slice %190 {offsets = [0, 32], sizes = [2, 32], strides = [1, 1]} : vector<2x128xf32> to vector<2x32xf32>
    %cst_105 = arith.constant 5.000000e-01 : f32
    %197 = vector.broadcast %cst_105 : f32 to vector<2x32xf32>
    %198 = arith.mulf %197, %196 : vector<2x32xf32>
    %cst_106 = arith.constant 5.000000e-01 : f32
    %199 = vector.broadcast %cst_106 : f32 to vector<2x32xf32>
    %200 = arith.addf %198, %199 : vector<2x32xf32>
    %201 = vector.extract_strided_slice %190 {offsets = [0, 64], sizes = [2, 32], strides = [1, 1]} : vector<2x128xf32> to vector<2x32xf32>
    %202 = vector.extract_strided_slice %190 {offsets = [0, 96], sizes = [2, 32], strides = [1, 1]} : vector<2x128xf32> to vector<2x32xf32>
    %cst_107 = arith.constant 5.000000e-01 : f32
    %203 = vector.broadcast %cst_107 : f32 to vector<2x32xf32>
    %204 = arith.mulf %203, %202 : vector<2x32xf32>
    %cst_108 = arith.constant 5.000000e-01 : f32
    %205 = vector.broadcast %cst_108 : f32 to vector<2x32xf32>
    %206 = arith.addf %204, %205 : vector<2x32xf32>
    %207 = arith.mulf %200, %184 : vector<2x32xf32>
    %208 = arith.mulf %195, %201 : vector<2x32xf32>
    %209 = arith.addf %207, %208 : vector<2x32xf32>
    %210 = math.tanh %209 : vector<2x32xf32>
    %211 = arith.mulf %206, %210 : vector<2x32xf32>
    %212 = vector.extract_strided_slice %58 {offsets = [12, 0], sizes = [2, 128], strides = [1, 1]} : vector<16x128xf32> to vector<2x128xf32>
    %cst_109 = arith.constant dense<0.000000e+00> : vector<2x128xf32>
    %213 = tpu.matmul %211, %59, %cst_109 {dimension_numbers = #tpu.dot_dimension_numbers<[1], [0], [0], [1], [0, 0, 1, 1], [], []>} : vector<2x32xf32>, vector<32x128xf32>, vector<2x128xf32> -> vector<2x128xf32>
    %214 = arith.addf %212, %213 : vector<2x128xf32>
    %215 = math.tanh %214 : vector<2x128xf32>
    %216 = vector.extract_strided_slice %215 {offsets = [0, 0], sizes = [2, 32], strides = [1, 1]} : vector<2x128xf32> to vector<2x32xf32>
    %cst_110 = arith.constant 5.000000e-01 : f32
    %217 = vector.broadcast %cst_110 : f32 to vector<2x32xf32>
    %218 = arith.mulf %217, %216 : vector<2x32xf32>
    %cst_111 = arith.constant 5.000000e-01 : f32
    %219 = vector.broadcast %cst_111 : f32 to vector<2x32xf32>
    %220 = arith.addf %218, %219 : vector<2x32xf32>
    %221 = vector.extract_strided_slice %215 {offsets = [0, 32], sizes = [2, 32], strides = [1, 1]} : vector<2x128xf32> to vector<2x32xf32>
    %cst_112 = arith.constant 5.000000e-01 : f32
    %222 = vector.broadcast %cst_112 : f32 to vector<2x32xf32>
    %223 = arith.mulf %222, %221 : vector<2x32xf32>
    %cst_113 = arith.constant 5.000000e-01 : f32
    %224 = vector.broadcast %cst_113 : f32 to vector<2x32xf32>
    %225 = arith.addf %223, %224 : vector<2x32xf32>
    %226 = vector.extract_strided_slice %215 {offsets = [0, 64], sizes = [2, 32], strides = [1, 1]} : vector<2x128xf32> to vector<2x32xf32>
    %227 = vector.extract_strided_slice %215 {offsets = [0, 96], sizes = [2, 32], strides = [1, 1]} : vector<2x128xf32> to vector<2x32xf32>
    %cst_114 = arith.constant 5.000000e-01 : f32
    %228 = vector.broadcast %cst_114 : f32 to vector<2x32xf32>
    %229 = arith.mulf %228, %227 : vector<2x32xf32>
    %cst_115 = arith.constant 5.000000e-01 : f32
    %230 = vector.broadcast %cst_115 : f32 to vector<2x32xf32>
    %231 = arith.addf %229, %230 : vector<2x32xf32>
    %232 = arith.mulf %225, %209 : vector<2x32xf32>
    %233 = arith.mulf %220, %226 : vector<2x32xf32>
    %234 = arith.addf %232, %233 : vector<2x32xf32>
    %235 = math.tanh %234 : vector<2x32xf32>
    %236 = arith.mulf %231, %235 : vector<2x32xf32>
    %237 = vector.extract_strided_slice %58 {offsets = [14, 0], sizes = [2, 128], strides = [1, 1]} : vector<16x128xf32> to vector<2x128xf32>
    %cst_116 = arith.constant dense<0.000000e+00> : vector<2x128xf32>
    %238 = tpu.matmul %236, %59, %cst_116 {dimension_numbers = #tpu.dot_dimension_numbers<[1], [0], [0], [1], [0, 0, 1, 1], [], []>} : vector<2x32xf32>, vector<32x128xf32>, vector<2x128xf32> -> vector<2x128xf32>
    %239 = arith.addf %237, %238 : vector<2x128xf32>
    %240 = math.tanh %239 : vector<2x128xf32>
    %241 = vector.extract_strided_slice %240 {offsets = [0, 0], sizes = [2, 32], strides = [1, 1]} : vector<2x128xf32> to vector<2x32xf32>
    %cst_117 = arith.constant 5.000000e-01 : f32
    %242 = vector.broadcast %cst_117 : f32 to vector<2x32xf32>
    %243 = arith.mulf %242, %241 : vector<2x32xf32>
    %cst_118 = arith.constant 5.000000e-01 : f32
    %244 = vector.broadcast %cst_118 : f32 to vector<2x32xf32>
    %245 = arith.addf %243, %244 : vector<2x32xf32>
    %246 = vector.extract_strided_slice %240 {offsets = [0, 32], sizes = [2, 32], strides = [1, 1]} : vector<2x128xf32> to vector<2x32xf32>
    %cst_119 = arith.constant 5.000000e-01 : f32
    %247 = vector.broadcast %cst_119 : f32 to vector<2x32xf32>
    %248 = arith.mulf %247, %246 : vector<2x32xf32>
    %cst_120 = arith.constant 5.000000e-01 : f32
    %249 = vector.broadcast %cst_120 : f32 to vector<2x32xf32>
    %250 = arith.addf %248, %249 : vector<2x32xf32>
    %251 = vector.extract_strided_slice %240 {offsets = [0, 64], sizes = [2, 32], strides = [1, 1]} : vector<2x128xf32> to vector<2x32xf32>
    %252 = vector.extract_strided_slice %240 {offsets = [0, 96], sizes = [2, 32], strides = [1, 1]} : vector<2x128xf32> to vector<2x32xf32>
    %cst_121 = arith.constant 5.000000e-01 : f32
    %253 = vector.broadcast %cst_121 : f32 to vector<2x32xf32>
    %254 = arith.mulf %253, %252 : vector<2x32xf32>
    %cst_122 = arith.constant 5.000000e-01 : f32
    %255 = vector.broadcast %cst_122 : f32 to vector<2x32xf32>
    %256 = arith.addf %254, %255 : vector<2x32xf32>
    %257 = arith.mulf %250, %234 : vector<2x32xf32>
    %258 = arith.mulf %245, %251 : vector<2x32xf32>
    %259 = arith.addf %257, %258 : vector<2x32xf32>
    %260 = math.tanh %259 : vector<2x32xf32>
    %261 = arith.mulf %256, %260 : vector<2x32xf32>
    %c0_123 = arith.constant 0 : index
    %c0_124 = arith.constant 0 : index
    %262 = vector.load %arg4[%c0_123, %c0_124] : memref<1x32xf32, #tpu.memory_space<vmem>>, vector<1x32xf32>
    %263 = vector.broadcast %262 : vector<1x32xf32> to vector<2x32xf32>
    %264 = arith.mulf %261, %263 : vector<2x32xf32>
    %cst_125 = arith.constant dense<0.000000e+00> : vector<2xf32>
    %265 = vector.multi_reduction <add>, %264, %cst_125 [1] : vector<2x32xf32> to vector<2xf32>
    %266 = vector.shape_cast %265 : vector<2xf32> to vector<2x1xf32>
    %c0_126 = arith.constant 0 : index
    %c0_127 = arith.constant 0 : index
    %267 = vector.load %arg5[%c0_126, %c0_127] : memref<1x1xf32, #tpu.memory_space<vmem>>, vector<1x1xf32>
    %268 = vector.broadcast %267 : vector<1x1xf32> to vector<2x1xf32>
    %269 = arith.addf %266, %268 : vector<2x1xf32>
    %c0_128 = arith.constant 0 : index
    %c0_129 = arith.constant 0 : index
    %270 = vector.load %arg6[%c0_128, %c0_129] : memref<2x1xf32, #tpu.memory_space<vmem>>, vector<2x1xf32>
    tpu.vector_store %arg6[%c0_128, %c0_129], %269 {strides = array<i32>} : memref<2x1xf32, #tpu.memory_space<vmem>>, vector<2x1xf32>,
    return
  }
}

</mosaic_0001>

<bundles_post_ra>
// kernel: tpu_custom_call.1
= control target key start
LH: loop header
LB: loop body
LE: loop exit
PB: predicated region body
PF: predicated region fallthrough
CT: control target
= control target key end

     0   :  { %s1705_s0 = inlined_call_operand.hbm [shape: f32[2,8,8], index: 0, kind: input, shape index: {}]   ;;  %s1706_s1 = inlined_call_operand.hbm [shape: f32[24,128], index: 1, kind: input, shape index: {}]   ;;  %s1707_s2 = inlined_call_operand.vmem [shape: f32[1,128], index: 2, kind: input, shape index: {}]   ;;  %s1708_s3 = inlined_call_operand.hbm [shape: f32[32,128], index: 3, kind: input, shape index: {}]   ;;  %s1709_s4 = inlined_call_operand.vmem [shape: f32[1,32], index: 4, kind: input, shape index: {}]   ;;  %s1710_s5 = inlined_call_operand.<no memory space> [shape: f32[1,1], index: 5, kind: input, shape index: {}]   ;;  %s1711_s6 = inlined_call_operand.vmem [shape: f32[2,1], index: 6, kind: output, shape index: {}]  }
   0x1   :  { %v11_v0 = vstv %s1710_s5 }
   0x2   :  { %12 = vst [vmem:[#allocation2] sm:$0x1] %v11_v0 }
   0x3   :  { %13 = vsyncpa [#allocation4], 0 }
   0x4   :  { %14 = vsyncpa [#allocation6], 0  ;;  %s1414_s23 = smov [#allocation5]   ;;  %s1415_s25 = smov [#allocation3]  }
   0x5   :  { %s32_s24 = sshll.u32 %s1414_s23, 4  ;;  %s20_s26 = sshll.u32 %s1415_s25, 4  ;;  %s33_s24 = int_to_ptr.vmem [resolvable:$true] %s32_s24  ;;  %s21_s26 = int_to_ptr.vmem [resolvable:$true] %s20_s26 }
   0x6   :  { %s1358_s27 = scalar_lea.vmem %s33_s24, 384  ;;  %p1363_p1 = scmp.lt.s32.totalorder %s33_s24, %s33_s24 }
   0x7   :  { %p1359_p0 = scmp.ne.s32.totalorder %s33_s24, %s1358_s27  ;;  %p1364_p2 = scmp.lt.s32.totalorder %s1358_s27, %s1358_s27 }
   0x9   :  { %p1365_p3 = por %p1364_p2, %p1363_p1 }
   0xb   :  { %p1366_p4 = pnand %p1365_p3, %p1359_p0 }
   0xd   :  { %1369 = shalt.err (!%p1366_p4)
}
   0xe   :  { %s1416_s28 = smov 128   ;;  %s1417_s29 = smov 8  }
   0xf   :  { %38 = dma.hbm_to_vmem [thread:$0]  %s1706_s1, 384, %s33_s24, [#allocation6], %s1416_s28, %s1416_s28, %s1417_s29  }
  0x10   :  { %s1378_s7 = scalar_lea.vmem %s21_s26, 256  ;;  %p1383_p6 = scmp.lt.s32.totalorder %s21_s26, %s21_s26 }
  0x11   :  { %p1379_p5 = scmp.ne.s32.totalorder %s21_s26, %s1378_s7  ;;  %p1384_p7 = scmp.lt.s32.totalorder %s1378_s7, %s1378_s7 }
  0x13   :  { %p1385_p8 = por %p1384_p7, %p1383_p6 }
  0x15   :  { %p1386_p9 = pnand %p1385_p8, %p1379_p5 }
  0x17   :  { %1389 = shalt.err (!%p1386_p9)
}
  0x18   :  { %26 = dma.hbm_to_vmem [thread:$0]  %s1705_s0, 256, %s21_s26, [#allocation4], %s1416_s28, %s1416_s28, %s1417_s29  }
  0x19   :  { %s1418_s10 = smov [#allocation7]  }
  0x1a   :  { %s46_s11 = sshll.u32 %s1418_s10, 4  ;;  %s47_s11 = int_to_ptr.vmem [resolvable:$true] %s46_s11 }
  0x1b   :  { %s1398_s12 = scalar_lea.vmem %s47_s11, 512  ;;  %p1403_p11 = scmp.lt.s32.totalorder %s47_s11, %s47_s11 }
  0x1c   :  { %p1399_p10 = scmp.ne.s32.totalorder %s47_s11, %s1398_s12  ;;  %p1404_p12 = scmp.lt.s32.totalorder %s1398_s12, %s1398_s12 }
  0x1e   :  { %p1405_p13 = por %p1404_p12, %p1403_p11 }
  0x20   :  { %p1406_p0 = pnand %p1405_p13, %p1399_p10 }
  0x22   :  { %1409 = shalt.err (!%p1406_p0)
}
  0x23   :  { %52 = dma.hbm_to_vmem [thread:$0]  %s1708_s3, 512, %s47_s11, [#allocation6], %s1416_s28, %s1416_s28, %s1417_s29  }
  0x24   :  { %1410 = dma.done.wait [#allocation4], 256  }
  0x25   :  { %1411 = vsyncadd [#allocation4], 4294967040 }
  0x26   :  { %1412 = dma.done.wait [#allocation6], 896  }
  0x27   :  { %1413 = vsyncadd [#allocation6], 4294966400  ;;  %vm73_vm0 = vcmask 1041409   ;;  %v89_v1 = vld [vmem:[#allocation3 + $0x2] sm:$0x1]  ;;  %s1419_s0 = smov 16  }
  0x28   :  { %v90_v2 = vld [vmem:[#allocation3 + $0xa] sm:$0x1]  ;;  %v68_v4 = vld [vmem:[#allocation3 + $0x1] sm:$0x1]  ;;  %v69_v5 = vld [vmem:[#allocation3 + $0x9] sm:$0x1] }
  0x29   :  { %v97_v3 = vrot.slane %v90_v2, 7  ;;  %v80_v6 = vrot.slane %v69_v5, 7  ;;  %v134_v7 = vld [vmem:[#allocation3 + $0x5] sm:$0x1]  ;;  %v135_v8 = vld [vmem:[#allocation3 + $0xd] sm:$0x1] }
  0x2a   :  { %v142_v10 = vrot.slane %v135_v8, 7  ;;  %v105_v11 = vld [vmem:[#allocation3 + $0xb] sm:$0x1]  ;;  %v67_v13 = vld [vmem:[#allocation3 + $0x8] sm:$0x1]  ;;  %v214_v26 = vld [vmem:[#allocation5 + $0x10] sm:$0xff] }
  0x2b   :  { %v1476_v9 = vsel %vm73_vm0, %v97_v3, %v89_v1  ;;  %v1481_v12 = vsel %vm73_vm0, %v80_v6, %v68_v4  ;;  %v112_v15 = vrot.slane %v105_v11, 7  ;;  %v104_v16 = vld [vmem:[#allocation3 + $0x3] sm:$0x1]  ;;  %v72_v17 = vrot.slane %v67_v13, 7  ;;  %v150_v18 = vld [vmem:[#allocation3 + $0xe] sm:$0x1]  ;;  %1210 = vmatprep.subr.mxu0 %v214_v26 }
  0x2c   :  { %107 = vrot.lane.b32.xlu1 %v1476_v9, %s1417_s29  ;;  %92 = vrot.lane.b32.xlu0 %v1481_v12, %s1417_s29  ;;  %v1486_v14 = vsel %vm73_vm0, %v142_v10, %v134_v7  ;;  %v66_v19 = vld [vmem:[#allocation3] sm:$0x1]  ;;  %v157_v21 = vrot.slane %v150_v18, 7  ;;  %v149_v23 = vld [vmem:[#allocation3 + $0x6] sm:$0x1]  ;;  %v1420_v29 = vmov 0.0  }
  0x2d   :  { %v1493_v20 = vsel %vm73_vm0, %v112_v15, %v104_v16  ;;  %v1496_v22 = vsel %vm73_vm0, %v72_v17, %v66_v19  ;;  %v120_v25 = vld [vmem:[#allocation3 + $0xc] sm:$0x1]  ;;  %v1509_v27 = vld [vmem:[#allocation7 + $0x18] sm:$0xff]  ;;  %1219 = vmatprep.subr.mxu1 %v1420_v29  ;;  %v165_v31 = vld [vmem:[#allocation3 + $0xf] sm:$0x1]  ;;  %1211 = vmatpush3.msra.mxu0 %v214_v26  ;;  %vm1421_vm1 = vmmov 0  }
  0x2e   :  { %v1503_v24 = vsel %vm73_vm0, %v157_v21, %v149_v23  ;;  %v127_v28 = vrot.slane %v120_v25, 7  ;;  %v119_v30 = vld [vmem:[#allocation3 + $0x4] sm:$0x1]  ;;  %1220 = vmatpush3.msra.mxu1 %v1509_v27  ;;  %v213_v32 = vld [vmem:[#allocation5 + $0x8] sm:$0xff]  ;;  %v212_v34 = vld [vmem:[#allocation5] sm:$0xff]  ;;  %v172_v36 = vrot.slane %v165_v31, 7  ;;  %1227 = vmatprep.mubr.msk.f32.mxu1 %vm1421_vm1, %v1420_v29 }
  0x2f   :  { %1212 = vmatprep.subr.mxu0 %v213_v32  ;;  %v1515_v33 = vld [vmem:[#allocation7 + $0x10] sm:$0xff]  ;;  %1221 = vmatprep.subr.mxu1 %v1420_v29  ;;  %v1524_v37 = vld [vmem:[#allocation7 + $0x8] sm:$0xff]  ;;  %v164_v38 = vld [vmem:[#allocation3 + $0x7] sm:$0x1]  ;;  %vm85_vm2 = vcmask 64512   ;;  %vm87_vm3 = vcmask 130048  }
  0x30   :  { %152 = vrot.lane.b32.xlu1 %v1486_v14, %s1417_s29  ;;  %99 = vrot.lane.b32.xlu0 %v1476_v9, %s1419_s0  ;;  %v1521_v35 = vsel %vm73_vm0, %v127_v28, %v119_v30  ;;  %v1529_v39 = vld [vmem:[#allocation7] sm:$0xff]  ;;  %v173_v40 = vsel %vm73_vm0, %v172_v36, %v164_v38  ;;  %vm203_vm4 = vcmask 1041408   ;;  %vm205_vm5 = vcmask 1043456   ;;  %s1422_s15 = smov 64   ;;  %s1423_s16 = smov 32  }
  0x31   :  { %1213 = vmatpush3.msra.mxu0 %v213_v32  ;;  %1222 = vmatpush3.msra.mxu1 %v1515_v33  ;;  %vm207_vm6 = vcmask 1045504   ;;  %vm222_vm7 = vcmask 195584   ;;  %vm308_vm8 = vcmask 261120   ;;  %s1424_s18 = smov 96   ;;  %vm1133_vm9 = vcmask 261126  }
  0x32   :  { %1214 = vmatprep.subr.mxu0 %v212_v34  ;;  %1223 = vmatprep.subr.mxu1 %v1420_v29  ;;  %vm1145_vm10 = vcmask 7174  }
  0x33   :  { %1215 = vmatpush3.msra.mxu0 %v212_v34  ;;  %1224 = vmatpush3.msra.mxu1 %v1524_v37 }
  0x34   :  { %114 = vrot.lane.b32.xlu1 %v1493_v20, %s1419_s0  ;;  %75 = vrot.lane.b32.xlu0 %v1496_v22, %s1417_s29 }
  0x35   :  { %1225 = vmatprep.subr.mxu1 %v1420_v29  ;;  %1230 = vmatprep.subr.mxu0 %v1420_v29 }
  0x36   :  { %1226 = vmatpush3.msra.mxu1 %v1529_v39 }
  0x37   :  { %1228 = vmatmul.mubr.f32.vlgmr.msra.gmra.mxu1 %v1420_v29  ;;  %1241 = vmatprep.subr.mxu1 %v1420_v29 }
  0x38   :  { %159 = vrot.lane.b32.xlu1 %v1503_v24, %s1419_s0  ;;  %122 = vrot.lane.b32.xlu0 %v1493_v20, %s1417_s29 }
  0x39   :  { %1242 = vmatpush3.msra.mxu1 %v1509_v27  ;;  %1249 = vmatprep.mubr.msk.f32.mxu1 %vm1421_vm1, %v1420_v29 }
  0x3a   :  { %1243 = vmatprep.subr.mxu1 %v1420_v29 }
  0x3b   :  { %1244 = vmatpush3.msra.mxu1 %v1515_v33 }
  0x3c   :  { %82 = vrot.lane.b32.xlu1 %v1481_v12, %s1419_s0  ;;  %167 = vrot.lane.b32.xlu0 %v1503_v24, %s1417_s29 }
  0x3d   :  { %1245 = vmatprep.subr.mxu1 %v1420_v29 }
  0x3e   :  { %1246 = vmatpush3.msra.mxu1 %v1524_v37 }
  0x3f   :  { %1247 = vmatprep.subr.mxu1 %v1420_v29 }
  0x40   :  { %137 = vrot.lane.b32.xlu1 %v1521_v35, %s1417_s29  ;;  %129 = vrot.lane.b32.xlu0 %v1521_v35, %s1419_s0 }
  0x41   :  { %1248 = vmatpush3.msra.mxu1 %v1529_v39 }
  0x42   :  { %1263 = vmatprep.subr.mxu1 %v1420_v29 }
  0x44   :  { %180 = vrot.lane.b32.xlu1 %v173_v40, %s1417_s29  ;;  %174 = vrot.lane.b32.xlu0 %v173_v40, %s1419_s0 }
  0x48   :  { %144 = vrot.lane.b32.xlu0 %v1486_v14, %s1419_s0 }
  0x9e   :  { %v108_v41 = vpop.permute.xlu1 %107  ;;  %v93_v42 = vpop.permute.xlu0 %92 }
  0x9f   :  { %v102_v49 = vsel %vm85_vm2, %v1496_v22, %v93_v42  ;;  %v117_v54 = vsel %vm85_vm2, %v1481_v12, %v108_v41  ;;  %v1153_v22 = vld [vmem:[%s1707_s2] ss:$0 sm:$0xff] }
  0xa2   :  { %v153_v43 = vpop.permute.xlu1 %152  ;;  %v100_v44 = vpop.permute.xlu0 %99 }
  0xa3   :  { %v103_v50 = vsel %vm87_vm3, %v102_v49, %v100_v44  ;;  %v162_v3 = vsel %vm85_vm2, %v1521_v35, %v153_v43 }
  0xa4   :  { %v186_v56 = vrot.slane %v103_v50, 6 }
  0xa6   :  { %v115_v45 = vpop.permute.xlu1 %114  ;;  %v76_v46 = vpop.permute.xlu0 %75 }
  0xa7   :  { %v86_v52 = vsel %vm85_vm2, 0.0, %v76_v46  ;;  %v118_v57 = vsel %vm87_vm3, %v117_v54, %v115_v45 }
  0xa8   :  { %v189_v62 = vrot.slane %v118_v57, 4 }
  0xaa   :  { %v160_v47 = vpop.permute.xlu1 %159  ;;  %v123_v48 = vpop.permute.xlu0 %122 }
  0xab   :  { %v132_v59 = vsel %vm85_vm2, %v1476_v9, %v123_v48  ;;  %v163_v7 = vsel %vm87_vm3, %v162_v3, %v160_v47 }
  0xac   :  { %v195_v11 = vrot.slane %v163_v7, 6 }
  0xae   :  { %v83_v51 = vpop.permute.xlu1 %82  ;;  %v168_v53 = vpop.permute.xlu0 %167 }
  0xaf   :  { %v88_v55 = vsel %vm87_vm3, %v86_v52, %v83_v51  ;;  %v177_v8 = vsel %vm85_vm2, %v1486_v14, %v168_v53 }
  0xb0   :  { %v204_v60 = vsel %vm203_vm4, %v88_v55, %v186_v56 }
  0xb1   :  { %v206_v1 = vsel %vm205_vm5, %v204_v60, %v189_v62 }
  0xb2   :  { %v138_v58 = vpop.permute.xlu1 %137  ;;  %v130_v61 = vpop.permute.xlu0 %129 }
  0xb3   :  { %v133_v63 = vsel %vm87_vm3, %v132_v59, %v130_v61  ;;  %v147_v12 = vsel %vm85_vm2, %v1493_v20, %v138_v58 }
  0xb4   :  { %v192_v0 = vrot.slane %v133_v63, 2 }
  0xb6   :  { %v181_v2 = vpop.permute.xlu1 %180  ;;  %v175_v4 = vpop.permute.xlu0 %174  ;;  %v208_v5 = vsel %vm207_vm6, %v206_v1, %v192_v0 }
  0xb7   :  { %v183_v6 = vsel %vm85_vm2, %v1503_v24, %v181_v2  ;;  %1216 = vmatprep.mubr.msk.f32.mxu0 %vm222_vm7, %v208_v5  ;;  %v178_v10 = vsel %vm87_vm3, %v177_v8, %v175_v4 }
  0xb8   :  { %v184_v9 = vsel %vm87_vm3, %v183_v6, 0.0  ;;  %v198_v16 = vrot.slane %v178_v10, 4 }
  0xb9   :  { %v201_v13 = vrot.slane %v184_v9, 2 }
  0xba   :  { %v145_v15 = vpop.permute.xlu0 %144 }
  0xbb   :  { %v148_v17 = vsel %vm87_vm3, %v147_v12, %v145_v15 }
  0xbc   :  { %v209_v18 = vsel %vm203_vm4, %v148_v17, %v195_v11 }
  0xbd   :  { %v210_v19 = vsel %vm205_vm5, %v209_v18, %v198_v16 }
  0xbe   :  { %v211_v14 = vsel %vm207_vm6, %v210_v19, %v201_v13 }
  0xbf   :  { %1217 = vmatmul.mubr.msk.f32.vlgmr.msra.gmra.mxu0 %vm222_vm7, %v211_v14 }
  0xc0   :  { %1231 = vmatpush3.msra.mxu0 %v1509_v27  ;;  %1238 = vmatprep.mubr.msk.f32.mxu0 %vm1421_vm1, %v1420_v29 }
  0xc1   :  { %1232 = vmatprep.subr.mxu0 %v1420_v29 }
  0xc2   :  { %1233 = vmatpush3.msra.mxu0 %v1515_v33 }
  0xc3   :  { %1234 = vmatprep.subr.mxu0 %v1420_v29 }
  0xc4   :  { %1235 = vmatpush3.msra.mxu0 %v1524_v37 }
  0xc5   :  { %1236 = vmatprep.subr.mxu0 %v1420_v29 }
  0xc6   :  { %1237 = vmatpush3.msra.mxu0 %v1529_v39 }
  0xc7   :  { %1252 = vmatprep.subr.mxu0 %v1420_v29 }
  0xf7   :  { %v378_v20 = vpop.f32.mrf.mxu1 }
  0xf9   :  { %v1229_v21 = vpop.f32.mrf.mxu1 }
 0x17f   :  { %v1218_v23 = vpop.f32.mrf.mxu0 }
 0x180   :  { %v1600_v24 = vadd.f32 %v1218_v23, %v1153_v22 }
 0x181   :  { %v295_v25 = vpop.f32.mrf.mxu0 }
 0x182   :  { %v1602_v26 = vadd.f32 %v1153_v22, %v295_v25 }
 0x184   :  { %v382_v28 = vadd.f32 %v378_v20, %v1602_v26 }
 0x186   :  { %1318 = vtanh.f32 %v382_v28 }
 0x193   :  { %v1319_v30 = vpop.eup %1318 }
 0x194   :  { %388 = vrot.lane.b32.xlu1 %v1319_v30, %s1422_s15  ;;  %v384_v31 = vmul.f32 0.5, %v1319_v30 }
 0x196   :  { %v385_v32 = vadd.f32 0.5, %v384_v31 }
 0x198   :  { %v386_v36 = vmul.f32 0.0, %v385_v32 }
 0x206   :  { %v389_v34 = vpop.permute.xlu1 %388 }
 0x207   :  { %v391_v35 = vmul.f32 %v389_v34, %v385_v32 }
 0x209   :  { %393 = vrot.lane.b32.xlu0 %v391_v35, %s1423_s16 }
 0x27b   :  { %v394_v38 = vpop.permute.xlu0 %393 }
 0x27c   :  { %v396_v40 = vadd.f32 %v394_v38, %v386_v36 }
 0x27e   :  { %1320 = vtanh.f32 %v396_v40  ;;  %v486_v54 = vrot.slane %v396_v40, 6 }
 0x28b   :  { %v1321_v41 = vpop.eup %1320 }
 0x28c   :  { %399 = vrot.lane.b32.xlu1 %v1321_v41, %s1422_s15 }
 0x2fe   :  { %v400_v42 = vpop.permute.xlu1 %399 }
 0x2ff   :  { %v402_v43 = vmul.f32 %v400_v42, %v385_v32 }
 0x301   :  { %404 = vrot.lane.b32.xlu0 %v402_v43, %s1423_s16 }
 0x373   :  { %v405_v44 = vpop.permute.xlu0 %404 }
 0x374   :  { %1239 = vmatmul.mubr.msk.f32.vlgmr.msra.gmra.mxu0 %vm308_vm8, %v405_v44 }
 0x375   :  { %1253 = vmatpush3.msra.mxu0 %v1509_v27  ;;  %1260 = vmatprep.mubr.msk.f32.mxu0 %vm1421_vm1, %v1420_v29 }
 0x376   :  { %1254 = vmatprep.subr.mxu0 %v1420_v29 }
 0x377   :  { %1255 = vmatpush3.msra.mxu0 %v1515_v33 }
 0x378   :  { %1256 = vmatprep.subr.mxu0 %v1420_v29 }
 0x379   :  { %1257 = vmatpush3.msra.mxu0 %v1524_v37 }
 0x37a   :  { %1258 = vmatprep.subr.mxu0 %v1420_v29 }
 0x37b   :  { %1259 = vmatpush3.msra.mxu0 %v1529_v39 }
 0x37c   :  { %1274 = vmatprep.subr.mxu0 %v1420_v29 }
 0x434   :  { %v474_v45 = vpop.f32.mrf.mxu0 }
 0x435   :  { %v479_v46 = vrot.slane %v474_v45, 6 }
 0x436   :  { %v1240_v47 = vpop.f32.mrf.mxu0 }
 0x437   :  { %v481_v48 = vadd.f32 %v479_v46, %v1602_v26 }
 0x439   :  { %1322 = vtanh.f32 %v481_v48 }
 0x446   :  { %v1323_v49 = vpop.eup %1322 }
 0x447   :  { %490 = vrot.lane.b32.xlu1 %v1323_v49, %s1422_s15  ;;  %v483_v50 = vmul.f32 0.5, %v1323_v49 }
 0x449   :  { %v484_v51 = vadd.f32 0.5, %v483_v50 }
 0x44b   :  { %v488_v55 = vmul.f32 %v486_v54, %v484_v51 }
 0x4b9   :  { %v491_v52 = vpop.permute.xlu1 %490 }
 0x4ba   :  { %v493_v53 = vmul.f32 %v491_v52, %v484_v51 }
 0x4bc   :  { %495 = vrot.lane.b32.xlu0 %v493_v53, %s1423_s16 }
 0x52e   :  { %v496_v56 = vpop.permute.xlu0 %495 }
 0x52f   :  { %v498_v57 = vadd.f32 %v496_v56, %v488_v55 }
 0x531   :  { %1324 = vtanh.f32 %v498_v57  ;;  %v589_v8 = vrot.slane %v498_v57, 6 }
 0x53e   :  { %v1325_v58 = vpop.eup %1324 }
 0x53f   :  { %501 = vrot.lane.b32.xlu1 %v1325_v58, %s1422_s15 }
 0x5b1   :  { %v502_v59 = vpop.permute.xlu1 %501 }
 0x5b2   :  { %v504_v60 = vmul.f32 %v502_v59, %v484_v51 }
 0x5b4   :  { %v506_v61 = vrot.slane %v504_v60, 2 }
 0x5b6   :  { %507 = vrot.lane.b32.xlu0 %v506_v61, %s1423_s16 }
 0x628   :  { %v508_v62 = vpop.permute.xlu0 %507 }
 0x629   :  { %1250 = vmatmul.mubr.msk.f32.vlgmr.msra.gmra.mxu1 %vm308_vm8, %v508_v62 }
 0x62a   :  { %1264 = vmatpush3.msra.mxu1 %v1509_v27  ;;  %1271 = vmatprep.mubr.msk.f32.mxu1 %vm1421_vm1, %v1420_v29 }
 0x62b   :  { %1265 = vmatprep.subr.mxu1 %v1420_v29 }
 0x62c   :  { %1266 = vmatpush3.msra.mxu1 %v1515_v33 }
 0x62d   :  { %1267 = vmatprep.subr.mxu1 %v1420_v29 }
 0x62e   :  { %1268 = vmatpush3.msra.mxu1 %v1524_v37 }
 0x62f   :  { %1269 = vmatprep.subr.mxu1 %v1420_v29 }
 0x630   :  { %1270 = vmatpush3.msra.mxu1 %v1529_v39 }
 0x631   :  { %1285 = vmatprep.subr.mxu1 %v1420_v29 }
 0x6e9   :  { %v577_v63 = vpop.f32.mrf.mxu1 }
 0x6ea   :  { %v582_v0 = vrot.slane %v577_v63, 4 }
 0x6eb   :  { %v1251_v1 = vpop.f32.mrf.mxu1 }
 0x6ec   :  { %v584_v2 = vadd.f32 %v582_v0, %v1602_v26 }
 0x6ee   :  { %1326 = vtanh.f32 %v584_v2 }
 0x6fb   :  { %v1327_v3 = vpop.eup %1326 }
 0x6fc   :  { %593 = vrot.lane.b32.xlu1 %v1327_v3, %s1422_s15  ;;  %v586_v4 = vmul.f32 0.5, %v1327_v3 }
 0x6fe   :  { %v587_v5 = vadd.f32 0.5, %v586_v4 }
 0x700   :  { %v591_v9 = vmul.f32 %v589_v8, %v587_v5 }
 0x76e   :  { %v594_v6 = vpop.permute.xlu1 %593 }
 0x76f   :  { %v596_v7 = vmul.f32 %v594_v6, %v587_v5 }
 0x771   :  { %598 = vrot.lane.b32.xlu0 %v596_v7, %s1423_s16 }
 0x7e3   :  { %v599_v10 = vpop.permute.xlu0 %598 }
 0x7e4   :  { %v601_v11 = vadd.f32 %v599_v10, %v591_v9 }
 0x7e6   :  { %1328 = vtanh.f32 %v601_v11  ;;  %v692_v30 = vrot.slane %v601_v11, 6 }
 0x7f3   :  { %v1329_v12 = vpop.eup %1328 }
 0x7f4   :  { %604 = vrot.lane.b32.xlu1 %v1329_v12, %s1422_s15 }
 0x866   :  { %v605_v13 = vpop.permute.xlu1 %604 }
 0x867   :  { %v607_v15 = vmul.f32 %v605_v13, %v587_v5 }
 0x869   :  { %v609_v16 = vrot.slane %v607_v15, 4 }
 0x86b   :  { %610 = vrot.lane.b32.xlu0 %v609_v16, %s1423_s16 }
 0x8dd   :  { %v611_v17 = vpop.permute.xlu0 %610 }
 0x8de   :  { %1261 = vmatmul.mubr.msk.f32.vlgmr.msra.gmra.mxu0 %vm308_vm8, %v611_v17 }
 0x8df   :  { %1275 = vmatpush3.msra.mxu0 %v1509_v27  ;;  %1282 = vmatprep.mubr.msk.f32.mxu0 %vm1421_vm1, %v1420_v29 }
 0x8e0   :  { %1276 = vmatprep.subr.mxu0 %v1420_v29 }
 0x8e1   :  { %1277 = vmatpush3.msra.mxu0 %v1515_v33 }
 0x8e2   :  { %1278 = vmatprep.subr.mxu0 %v1420_v29 }
 0x8e3   :  { %1279 = vmatpush3.msra.mxu0 %v1524_v37 }
 0x8e4   :  { %1280 = vmatprep.subr.mxu0 %v1420_v29 }
 0x8e5   :  { %1281 = vmatpush3.msra.mxu0 %v1529_v39 }
 0x8e6   :  { %1296 = vmatprep.subr.mxu0 %v1420_v29 }
 0x99e   :  { %v680_v18 = vpop.f32.mrf.mxu0 }
 0x99f   :  { %v685_v19 = vrot.slane %v680_v18, 2 }
 0x9a0   :  { %v1262_v14 = vpop.f32.mrf.mxu0 }
 0x9a1   :  { %v687_v20 = vadd.f32 %v685_v19, %v1602_v26 }
 0x9a3   :  { %1330 = vtanh.f32 %v687_v20 }
 0x9b0   :  { %v1331_v21 = vpop.eup %1330 }
 0x9b1   :  { %696 = vrot.lane.b32.xlu1 %v1331_v21, %s1422_s15  ;;  %v689_v22 = vmul.f32 0.5, %v1331_v21 }
 0x9b3   :  { %v690_v23 = vadd.f32 0.5, %v689_v22 }
 0x9b5   :  { %v694_v31 = vmul.f32 %v692_v30, %v690_v23 }
 0xa23   :  { %v697_v25 = vpop.permute.xlu1 %696 }
 0xa24   :  { %v699_v28 = vmul.f32 %v697_v25, %v690_v23 }
 0xa26   :  { %701 = vrot.lane.b32.xlu0 %v699_v28, %s1423_s16 }
 0xa98   :  { %v702_v32 = vpop.permute.xlu0 %701 }
 0xa99   :  { %v704_v34 = vadd.f32 %v702_v32, %v694_v31 }
 0xa9b   :  { %1332 = vtanh.f32 %v704_v34  ;;  %v792_v49 = vrot.slane %v704_v34, 6 }
 0xaa8   :  { %v1333_v35 = vpop.eup %1332 }
 0xaa9   :  { %707 = vrot.lane.b32.xlu1 %v1333_v35, %s1422_s15 }
 0xb1b   :  { %v708_v36 = vpop.permute.xlu1 %707 }
 0xb1c   :  { %v710_v26 = vmul.f32 %v708_v36, %v690_v23 }
 0xb1e   :  { %v712_v38 = vrot.slane %v710_v26, 6 }
 0xb20   :  { %713 = vrot.lane.b32.xlu0 %v712_v38, %s1423_s16  ;;  %v1163_v38 = vld [vmem:[%s1709_s4] ss:$0 sm:$0xff] }
 0xb92   :  { %v714_v40 = vpop.permute.xlu0 %713 }
 0xb93   :  { %1272 = vmatmul.mubr.msk.f32.vlgmr.msra.gmra.mxu1 %vm308_vm8, %v714_v40 }
 0xb94   :  { %1286 = vmatpush3.msra.mxu1 %v1509_v27  ;;  %1293 = vmatprep.mubr.msk.f32.mxu1 %vm1421_vm1, %v1420_v29 }
 0xb95   :  { %1287 = vmatprep.subr.mxu1 %v1420_v29 }
 0xb96   :  { %1288 = vmatpush3.msra.mxu1 %v1515_v33 }
 0xb97   :  { %1289 = vmatprep.subr.mxu1 %v1420_v29 }
 0xb98   :  { %1290 = vmatpush3.msra.mxu1 %v1524_v37 }
 0xb99   :  { %1291 = vmatprep.subr.mxu1 %v1420_v29 }
 0xb9a   :  { %1292 = vmatpush3.msra.mxu1 %v1529_v39 }
 0xc53   :  { %v783_v41 = vpop.f32.mrf.mxu1 }
 0xc54   :  { %v787_v42 = vadd.f32 %v783_v41, %v1600_v24 }
 0xc55   :  { %v1273_v43 = vpop.f32.mrf.mxu1 }
 0xc56   :  { %1334 = vtanh.f32 %v787_v42 }
 0xc63   :  { %v1335_v44 = vpop.eup %1334 }
 0xc64   :  { %796 = vrot.lane.b32.xlu1 %v1335_v44, %s1422_s15  ;;  %v789_v45 = vmul.f32 0.5, %v1335_v44 }
 0xc66   :  { %v790_v46 = vadd.f32 0.5, %v789_v45 }
 0xc68   :  { %v794_v50 = vmul.f32 %v792_v49, %v790_v46 }
 0xcd6   :  { %v797_v47 = vpop.permute.xlu1 %796 }
 0xcd7   :  { %v799_v48 = vmul.f32 %v797_v47, %v790_v46 }
 0xcd9   :  { %801 = vrot.lane.b32.xlu0 %v799_v48, %s1423_s16 }
 0xd4b   :  { %v802_v51 = vpop.permute.xlu0 %801 }
 0xd4c   :  { %v804_v52 = vadd.f32 %v802_v51, %v794_v50  ;;  %v1164_v50 = vld [vmem:[#allocation2] ss:$0 sm:$0xff] }
 0xd4e   :  { %1336 = vtanh.f32 %v804_v52 }
 0xd5b   :  { %v1337_v53 = vpop.eup %1336 }
 0xd5c   :  { %807 = vrot.lane.b32.xlu1 %v1337_v53, %s1422_s15 }
 0xdce   :  { %v808_v54 = vpop.permute.xlu1 %807 }
 0xdcf   :  { %v810_v55 = vmul.f32 %v808_v54, %v790_v46 }
 0xdd1   :  { %812 = vrot.lane.b32.xlu0 %v810_v55, %s1423_s16 }
 0xe43   :  { %v813_v56 = vpop.permute.xlu0 %812 }
 0xe44   :  { %1283 = vmatmul.mubr.msk.f32.vlgmr.msra.gmra.mxu0 %vm308_vm8, %v813_v56 }
 0xe45   :  { %1297 = vmatpush3.msra.mxu0 %v1509_v27  ;;  %1304 = vmatprep.mubr.msk.f32.mxu0 %vm1421_vm1, %v1420_v29 }
 0xe46   :  { %1298 = vmatprep.subr.mxu0 %v1420_v29 }
 0xe47   :  { %1299 = vmatpush3.msra.mxu0 %v1515_v33 }
 0xe48   :  { %1300 = vmatprep.subr.mxu0 %v1420_v29 }
 0xe49   :  { %1301 = vmatpush3.msra.mxu0 %v1524_v37  ;;  %v894_v37 = vrot.slane %v804_v52, 6 }
 0xe4a   :  { %1302 = vmatprep.subr.mxu0 %v1420_v29 }
 0xe4b   :  { %1303 = vmatpush3.msra.mxu0 %v1529_v39 }
 0xf04   :  { %v882_v57 = vpop.f32.mrf.mxu0 }
 0xf05   :  { %v887_v58 = vrot.slane %v882_v57, 6 }
 0xf06   :  { %v1284_v59 = vpop.f32.mrf.mxu0 }
 0xf07   :  { %v889_v27 = vadd.f32 %v887_v58, %v1600_v24 }
 0xf09   :  { %1338 = vtanh.f32 %v889_v27 }
 0xf16   :  { %v1339_v60 = vpop.eup %1338 }
 0xf17   :  { %898 = vrot.lane.b32.xlu1 %v1339_v60, %s1422_s15  ;;  %v891_v61 = vmul.f32 0.5, %v1339_v60 }
 0xf19   :  { %v892_v62 = vadd.f32 0.5, %v891_v61 }
 0xf1b   :  { %v896_v0 = vmul.f32 %v894_v37, %v892_v62 }
 0xf89   :  { %v899_v33 = vpop.permute.xlu1 %898 }
 0xf8a   :  { %v901_v63 = vmul.f32 %v899_v33, %v892_v62 }
 0xf8c   :  { %903 = vrot.lane.b32.xlu0 %v901_v63, %s1423_s16 }
 0xffe   :  { %v904_v29 = vpop.permute.xlu0 %903 }
 0xfff   :  { %v906_v1 = vadd.f32 %v904_v29, %v896_v0 }
0x1001   :  { %1340 = vtanh.f32 %v906_v1  ;;  %v997_v16 = vrot.slane %v906_v1, 6 }
0x100e   :  { %v1341_v39 = vpop.eup %1340 }
0x100f   :  { %909 = vrot.lane.b32.xlu1 %v1341_v39, %s1422_s15 }
0x1081   :  { %v910_v2 = vpop.permute.xlu1 %909 }
0x1082   :  { %v912_v3 = vmul.f32 %v910_v2, %v892_v62 }
0x1084   :  { %v914_v4 = vrot.slane %v912_v3, 2 }
0x1086   :  { %915 = vrot.lane.b32.xlu0 %v914_v4, %s1423_s16 }
0x10f8   :  { %v916_v5 = vpop.permute.xlu0 %915 }
0x10f9   :  { %1294 = vmatmul.mubr.msk.f32.vlgmr.msra.gmra.mxu1 %vm308_vm8, %v916_v5 }
0x11b9   :  { %v985_v6 = vpop.f32.mrf.mxu1 }
0x11ba   :  { %v990_v7 = vrot.slane %v985_v6, 4 }
0x11bb   :  { %v1295_v8 = vpop.f32.mrf.mxu1 }
0x11bc   :  { %v992_v9 = vadd.f32 %v990_v7, %v1600_v24 }
0x11be   :  { %1342 = vtanh.f32 %v992_v9 }
0x11cb   :  { %v1343_v10 = vpop.eup %1342 }
0x11cc   :  { %1001 = vrot.lane.b32.xlu1 %v1343_v10, %s1422_s15  ;;  %v994_v11 = vmul.f32 0.5, %v1343_v10 }
0x11ce   :  { %v995_v12 = vadd.f32 0.5, %v994_v11 }
0x11d0   :  { %v999_v17 = vmul.f32 %v997_v16, %v995_v12 }
0x123e   :  { %v1002_v13 = vpop.permute.xlu1 %1001 }
0x123f   :  { %v1004_v15 = vmul.f32 %v1002_v13, %v995_v12 }
0x1241   :  { %1006 = vrot.lane.b32.xlu0 %v1004_v15, %s1423_s16 }
0x12b3   :  { %v1007_v18 = vpop.permute.xlu0 %1006 }
0x12b4   :  { %v1009_v19 = vadd.f32 %v1007_v18, %v999_v17 }
0x12b6   :  { %1344 = vtanh.f32 %v1009_v19  ;;  %v1100_v40 = vrot.slane %v1009_v19, 6 }
0x12c3   :  { %v1345_v14 = vpop.eup %1344 }
0x12c4   :  { %1012 = vrot.lane.b32.xlu1 %v1345_v14, %s1422_s15 }
0x1336   :  { %v1013_v20 = vpop.permute.xlu1 %1012 }
0x1337   :  { %v1015_v21 = vmul.f32 %v1013_v20, %v995_v12 }
0x1339   :  { %v1017_v22 = vrot.slane %v1015_v21, 4 }
0x133b   :  { %1018 = vrot.lane.b32.xlu0 %v1017_v22, %s1423_s16 }
0x13ad   :  { %v1019_v23 = vpop.permute.xlu0 %1018 }
0x13ae   :  { %1305 = vmatmul.mubr.msk.f32.vlgmr.msra.gmra.mxu0 %vm308_vm8, %v1019_v23 }
0x146e   :  { %v1088_v25 = vpop.f32.mrf.mxu0 }
0x146f   :  { %v1093_v28 = vrot.slane %v1088_v25, 2 }
0x1470   :  { %v1306_v30 = vpop.f32.mrf.mxu0 }
0x1471   :  { %v1095_v31 = vadd.f32 %v1093_v28, %v1600_v24 }
0x1473   :  { %1346 = vtanh.f32 %v1095_v31 }
0x1480   :  { %v1347_v32 = vpop.eup %1346 }
0x1481   :  { %1104 = vrot.lane.b32.xlu1 %v1347_v32, %s1422_s15  ;;  %v1097_v34 = vmul.f32 0.5, %v1347_v32 }
0x1483   :  { %v1098_v35 = vadd.f32 0.5, %v1097_v34 }
0x1485   :  { %v1102_v41 = vmul.f32 %v1100_v40, %v1098_v35 }
0x14f3   :  { %v1105_v36 = vpop.permute.xlu1 %1104 }
0x14f4   :  { %v1107_v26 = vmul.f32 %v1105_v36, %v1098_v35 }
0x14f6   :  { %1109 = vrot.lane.b32.xlu0 %v1107_v26, %s1423_s16 }
0x14fa   :  { %1125 = vrot.lane.b32.xlu0 %v1163_v38, %s1424_s18 }
0x1568   :  { %v1110_v42 = vpop.permute.xlu0 %1109 }
0x1569   :  { %v1112_v24 = vadd.f32 %v1110_v42, %v1102_v41 }
0x156b   :  { %1348 = vtanh.f32 %v1112_v24 }
0x156c   :  { %v1126_v45 = vpop.permute.xlu0 %1125 }
0x1578   :  { %v1349_v43 = vpop.eup %1348 }
0x1579   :  { %1115 = vrot.lane.b32.xlu1 %v1349_v43, %s1422_s15 }
0x15eb   :  { %v1116_v44 = vpop.permute.xlu1 %1115 }
0x15ec   :  { %v1118_v46 = vmul.f32 %v1116_v44, %v1098_v35 }
0x15ee   :  { %v1128_v47 = vmul.f32 %v1126_v45, %v1118_v46 }
0x15f0   :  { %1130 = vrot.lane.b32.xlu1 %v1128_v47, %s1423_s16 }
0x1662   :  { %v1131_v48 = vpop.permute.xlu1 %1130 }
0x1663   :  { %v1134_v49 = vsel %vm1133_vm9, %v1131_v48, 0.0 }
0x1664   :  { %1135 = vadd.xlane.f32.xlu0 %v1134_v49 }
0x16ed   :  { %v1136_v51 = vpop.xlane.xlu0 %1135 }
0x16ee   :  { %v1144_v52 = vadd.f32 %v1164_v50, %v1136_v51 }
0x16f0   :  { %1146 = vst.msk [vmem:[%s1711_s6 - $0x6] sm:$0xc0] %vm1145_vm10, %v1144_v52 }
0x16f1   :  { %1151 = vsyncpa [#allocation4], 1 }
0x16f2   :  { %1152 = vsyncpa [#allocation6], 1 }

</bundles_post_ra>
